<compile_context>
chip_gen: v7x
topology: tpu7x:2x2x1
jax: 0.10.0
libtpu: 0.0.40
codegen_flags: <defaults>
</compile_context>

<pallas_src>
import jax
import jax.numpy as jnp
from jax.experimental import pallas as pl
from jax.experimental.pallas import tpu as pltpu


def _round_up(n, m):
    return ((n + m - 1) // m) * m


def _policy_mlp_kernel(xt_ref, w1_ref, b1_ref, w2_ref, b2_ref, out_ref):
    # xt_ref : (K_pad, B_tile)     f32   transposed states (lane-dense in batch)
    # w1_ref : (H_pad, K_pad)      f32   pinned across grid steps
    # b1_ref : (H_pad, 1)          f32   pinned
    # w2_ref : (O_pad8, H_pad)     f32   pinned (rows >= output_dim are zero)
    # b2_ref : (output_dim, 1)     f32   pinned
    # out_ref: (output_dim, B_tile) f32  lane-dense output, exact bytes
    out_dim = out_ref.shape[0]

    # ---- Layer 1 on the MXU: tiny K (=8 after padding) contraction. ----
    h = jnp.dot(w1_ref[...], xt_ref[...], preferred_element_type=jnp.float32)
    h = jnp.maximum(h + b1_ref[...], 0.0)            # bias + ReLU on the VPU

    # ---- Layer 2 on the MXU: K = H_pad (64) contraction. ----
    o = jnp.dot(w2_ref[...], h, preferred_element_type=jnp.float32)
    o = o[:out_dim, :] + b2_ref[...]                  # drop padded rows, add bias
    out_ref[...] = o.astype(out_ref.dtype)


def pack_params(w1, b1, w2, b2):
    """One-time packing of PyTorch-layout params ([out, in] weights) into the
    transposed kernel layout. Call at init time, NOT per forward call.

      w1p: (H_pad, K_pad)   b1p: (H_pad, 1)
      w2p: (O_pad8, H_pad)  b2p: (output_dim, 1)

    Zero padding is inert: padded hidden rows give relu(0)=0 and multiply zero
    w2 columns; padded x^T rows multiply zero w1 columns; padded w2 rows are
    sliced off inside the kernel.
    """
    hidden, input_dim = w1.shape
    output_dim = w2.shape[0]
    k_pad = _round_up(input_dim, 8)      # sublane-pad the tiny contraction dim
    h_pad = _round_up(hidden, 8)         # 64 -> 64 (already aligned)
    o_pad = _round_up(output_dim, 8)     # MXU LHS row pad; sliced in-kernel

    w1p = jnp.zeros((h_pad, k_pad), jnp.float32).at[:hidden, :input_dim].set(w1)
    b1p = jnp.zeros((h_pad, 1), jnp.float32).at[:hidden, 0].set(b1)
    w2p = jnp.zeros((o_pad, h_pad), jnp.float32).at[:output_dim, :hidden].set(w2)
    b2p = jnp.asarray(b2, jnp.float32).reshape(output_dim, 1)
    return w1p, b1p, w2p, b2p, input_dim, output_dim


def policy_network_forward(x, packed, *, b_tile=1024):
    """Batched forward pass. x: [B, input_dim] f32 -> [B, output_dim] f32.

    b_tile must be a multiple of 128 (lane width); use a multiple of 256 to
    fill the 256-wide MXU on v6e/v7x (128 is already native on v5e).
    """
    assert b_tile % 128 == 0
    w1p, b1p, w2p, b2p, input_dim, output_dim = packed
    k_pad = w1p.shape[1]
    B = x.shape[0]
    b_pad = _round_up(max(B, 1), b_tile)

    # Transposed, lane-dense-in-batch layout (states become columns).
    # Best built directly at rollout-assembly time; done here it is a single
    # cheap ~8-bytes-per-state repack, only non-trivial when B % b_tile != 0.
    xt = jnp.zeros((k_pad, b_pad), jnp.float32).at[:input_dim, :B].set(x.T)

    grid = (b_pad // b_tile,)
    out_t = pl.pallas_call(
        _policy_mlp_kernel,
        out_shape=jax.ShapeDtypeStruct((output_dim, b_pad), jnp.float32),
        grid=grid,
        in_specs=[
            pl.BlockSpec((k_pad, b_tile), lambda i: (0, i)),   # stream x^T tiles
            pl.BlockSpec(w1p.shape, lambda i: (0, 0)),         # pinned weights
            pl.BlockSpec(b1p.shape, lambda i: (0, 0)),
            pl.BlockSpec(w2p.shape, lambda i: (0, 0)),
            pl.BlockSpec(b2p.shape, lambda i: (0, 0)),
        ],
        out_specs=pl.BlockSpec((output_dim, b_tile), lambda i: (0, i)),
        compiler_params=pltpu.CompilerParams(
            dimension_semantics=("parallel",)),                # v7x: 2 TCs
    )(xt, w1p, b1p, w2p, b2p)

    # Back to PyTorch output layout; a tiny (output_dim x B) transpose.
    return out_t[:, :B].T


def init_params(key, input_dim, hidden, output_dim):
    """Deterministic init mimicking PyTorch nn.Linear default U(-1/sqrt(fan_in), +)."""
    k1, k2, k3, k4 = jax.random.split(key, 4)
    bound1 = 1.0 / jnp.sqrt(jnp.float32(input_dim))
    bound2 = 1.0 / jnp.sqrt(jnp.float32(hidden))
    w1 = jax.random.uniform(k1, (hidden, input_dim), jnp.float32, -bound1, bound1)
    b1 = jax.random.uniform(k2, (hidden,), jnp.float32, -bound1, bound1)
    w2 = jax.random.uniform(k3, (output_dim, hidden), jnp.float32, -bound2, bound2)
    b2 = jax.random.uniform(k4, (output_dim,), jnp.float32, -bound2, bound2)
    return w1, b1, w2, b2


if __name__ == "__main__":
    # MountainCarContinuous: input_dim=2 (state), output_dim=2 (mean, pre-sigmoid scale).
    INPUT_DIM, HIDDEN, OUTPUT_DIM = 2, 64, 2
    B, B_TILE = 4096, 1024      # batch a whole rollout of states per call

    key = jax.random.PRNGKey(0)
    kx, kp = jax.random.split(key)
    x = jax.random.normal(kx, (B, INPUT_DIM), jnp.float32)
    w1, b1, w2, b2 = init_params(kp, INPUT_DIM, HIDDEN, OUTPUT_DIM)

    packed = pack_params(w1, b1, w2, b2)               # one-time packing
    out = policy_network_forward(x, packed, b_tile=B_TILE)
    out = jax.block_until_ready(out)

    # Pure-JAX reference of the same forward pass (PyTorch semantics).
    ref = jnp.maximum(x @ w1.T + b1, 0.0) @ w2.T + b2
    assert out.shape == (B, OUTPUT_DIM)
    assert jnp.allclose(out, ref, atol=1e-5, rtol=1e-5)

    # Ragged-batch path (B not a multiple of the tile) also works: padded
    # columns are zeros and get sliced off.
    x_small = jax.random.normal(jax.random.PRNGKey(1), (50, INPUT_DIM), jnp.float32)
    out_small = jax.block_until_ready(
        policy_network_forward(x_small, packed, b_tile=B_TILE))
    ref_small = jnp.maximum(x_small @ w1.T + b1, 0.0) @ w2.T + b2
    assert out_small.shape == (50, OUTPUT_DIM)
    assert jnp.allclose(out_small, ref_small, atol=1e-5, rtol=1e-5)

    # TODO(synk): act()/train_net() (Normal sampling, log-prob, discounted returns,
    # Adam step) are host-side RL bookkeeping, not forward-pass compute, so they
    # are not kernelized.
    print("KERNEL_OK")
</pallas_src>

<mosaic_0001>
module attributes {stable_mosaic.version = 11 : i64} {
  func.func @_policy_mlp_kernel(%arg0: i32, %arg1: memref<8x1024xf32, #tpu.memory_space<vmem>>, %arg2: memref<64x8xf32, #tpu.memory_space<vmem>>, %arg3: memref<64x1xf32, #tpu.memory_space<vmem>>, %arg4: memref<8x64xf32, #tpu.memory_space<vmem>>, %arg5: memref<2x1xf32, #tpu.memory_space<vmem>>, %arg6: memref<2x1024xf32, #tpu.memory_space<vmem>>) attributes {dimension_semantics = [#tpu.dimension_semantics<parallel>], iteration_bounds = array<i64: 4>, scalar_prefetch = 0 : i64, scratch_operands = 0 : i64, tpu.core_type = #tpu.core_type<tc>, window_params = [{transform_indices = @transform_0, window_bounds = array<i64: 8, 1024>}, {pipeline_mode = #tpu.pipeline_mode<synchronous>, transform_indices = @transform_1, window_bounds = array<i64: 64, 8>}, {pipeline_mode = #tpu.pipeline_mode<synchronous>, transform_indices = @transform_2, window_bounds = array<i64: 64, 1>}, {pipeline_mode = #tpu.pipeline_mode<synchronous>, transform_indices = @transform_3, window_bounds = array<i64: 8, 64>}, {pipeline_mode = #tpu.pipeline_mode<synchronous>, transform_indices = @transform_4, window_bounds = array<i64: 2, 1>}, {transform_indices = @transform_5, window_bounds = array<i64: 2, 1024>}]} {
    %c0 = arith.constant 0 : index
    %c0_0 = arith.constant 0 : index
    %0 = vector.load %arg2[%c0, %c0_0] : memref<64x8xf32, #tpu.memory_space<vmem>>, vector<64x8xf32>
    %c0_1 = arith.constant 0 : index
    %c0_2 = arith.constant 0 : index
    %1 = vector.load %arg1[%c0_1, %c0_2] : memref<8x1024xf32, #tpu.memory_space<vmem>>, vector<8x1024xf32>
    %cst = arith.constant dense<0.000000e+00> : vector<64x1024xf32>
    %2 = tpu.matmul %0, %1, %cst {dimension_numbers = #tpu.dot_dimension_numbers<[1], [0], [0], [1], [0, 0, 1, 1], [], []>} : vector<64x8xf32>, vector<8x1024xf32>, vector<64x1024xf32> -> vector<64x1024xf32>
    %c0_3 = arith.constant 0 : index
    %c0_4 = arith.constant 0 : index
    %3 = vector.load %arg3[%c0_3, %c0_4] : memref<64x1xf32, #tpu.memory_space<vmem>>, vector<64x1xf32>
    %4 = vector.broadcast %3 : vector<64x1xf32> to vector<64x1024xf32>
    %5 = arith.addf %2, %4 : vector<64x1024xf32>
    %cst_5 = arith.constant 0.000000e+00 : f32
    %6 = vector.broadcast %cst_5 : f32 to vector<64x1024xf32>
    %7 = arith.maximumf %5, %6 : vector<64x1024xf32>
    %c0_6 = arith.constant 0 : index
    %c0_7 = arith.constant 0 : index
    %8 = vector.load %arg4[%c0_6, %c0_7] : memref<8x64xf32, #tpu.memory_space<vmem>>, vector<8x64xf32>
    %cst_8 = arith.constant dense<0.000000e+00> : vector<8x1024xf32>
    %9 = tpu.matmul %8, %7, %cst_8 {dimension_numbers = #tpu.dot_dimension_numbers<[1], [0], [0], [1], [0, 0, 1, 1], [], []>} : vector<8x64xf32>, vector<64x1024xf32>, vector<8x1024xf32> -> vector<8x1024xf32>
    %10 = vector.extract_strided_slice %9 {offsets = [0, 0], sizes = [2, 1024], strides = [1, 1]} : vector<8x1024xf32> to vector<2x1024xf32>
    %c0_9 = arith.constant 0 : index
    %c0_10 = arith.constant 0 : index
    %11 = vector.load %arg5[%c0_9, %c0_10] : memref<2x1xf32, #tpu.memory_space<vmem>>, vector<2x1xf32>
    %12 = vector.broadcast %11 : vector<2x1xf32> to vector<2x1024xf32>
    %13 = arith.addf %10, %12 : vector<2x1024xf32>
    %c0_11 = arith.constant 0 : index
    %c0_12 = arith.constant 0 : index
    %14 = vector.load %arg6[%c0_11, %c0_12] : memref<2x1024xf32, #tpu.memory_space<vmem>>, vector<2x1024xf32>
    tpu.vector_store %arg6[%c0_11, %c0_12], %13 {strides = array<i32>} : memref<2x1024xf32, #tpu.memory_space<vmem>>, vector<2x1024xf32>,
    return
  }
  func.func @transform_0(%arg0: i32) -> (i32, i32) {
    %c0_i32 = arith.constant 0 : i32
    %c0_i32_0 = arith.constant 0 : i32
    return %c0_i32, %arg0 : i32, i32
  }
  func.func @transform_1(%arg0: i32) -> (i32, i32) {
    %c0_i32 = arith.constant 0 : i32
    %c0_i32_0 = arith.constant 0 : i32
    %c0_i32_1 = arith.constant 0 : i32
    return %c0_i32, %c0_i32_0 : i32, i32
  }
  func.func @transform_2(%arg0: i32) -> (i32, i32) {
    %c0_i32 = arith.constant 0 : i32
    %c0_i32_0 = arith.constant 0 : i32
    %c0_i32_1 = arith.constant 0 : i32
    return %c0_i32, %c0_i32_0 : i32, i32
  }
  func.func @transform_3(%arg0: i32) -> (i32, i32) {
    %c0_i32 = arith.constant 0 : i32
    %c0_i32_0 = arith.constant 0 : i32
    %c0_i32_1 = arith.constant 0 : i32
    return %c0_i32, %c0_i32_0 : i32, i32
  }
  func.func @transform_4(%arg0: i32) -> (i32, i32) {
    %c0_i32 = arith.constant 0 : i32
    %c0_i32_0 = arith.constant 0 : i32
    %c0_i32_1 = arith.constant 0 : i32
    return %c0_i32, %c0_i32_0 : i32, i32
  }
  func.func @transform_5(%arg0: i32) -> (i32, i32) {
    %c0_i32 = arith.constant 0 : i32
    %c0_i32_0 = arith.constant 0 : i32
    return %c0_i32, %arg0 : i32, i32
  }
}

</mosaic_0001>

<bundles_post_ra>
// kernel: tpu_custom_call.1
= control target key start
LH: loop header
LB: loop body
LE: loop exit
PB: predicated region body
PF: predicated region fallthrough
CT: control target
= control target key end

     0   :  { %10 = vsyncpa [#allocation3], 0  ;;  %s1960_s0 = inlined_call_operand.hbm [shape: f32[8,4096], index: 0, kind: input, shape index: {}]   ;;  %s1961_s1 = inlined_call_operand.vmem [shape: f32[64,8], index: 1, kind: input, shape index: {}]   ;;  %s1962_s2 = inlined_call_operand.vmem [shape: f32[64,1], index: 2, kind: input, shape index: {}]   ;;  %s1963_s3 = inlined_call_operand.vmem [shape: f32[8,64], index: 3, kind: input, shape index: {}]   ;;  %s1964_s4 = inlined_call_operand.vmem [shape: f32[2,1], index: 4, kind: input, shape index: {}]   ;;  %s1965_s5 = inlined_call_operand.hbm [shape: f32[2,4096], index: 5, kind: output, shape index: {}]  }
   0x1   :  { %12 = vsyncpa [#allocation3 + $0x1], 0 }
   0x2   :  { %13 = vsyncpa [#allocation4], 0 }
   0x3   :  { %15 = vsyncpa [#allocation4 + $0x1], 0  ;;  %s1582_s18 = smov 0   ;;  %s1584_s19 = smov 0  }
   0x4   :  { %s1586_s20 = smov 0   ;;  %s1588_s21 = smov 0  }
   0x5 LB: > { %s1603_s22 = sadd.s32 4294967295, %s1545_s21   ;;  %s1282_s23 = sadd.s32 4294967294, %s1545_s21   ;;  %s1545_s21 = sphi %s1588_s21, %s1979_s21   ;;  %s1541_s20 = sphi %s1586_s20, %s1978_s20   ;;  %s1537_s19 = sphi %s1584_s19, %s1977_s19   ;;  %s1533_s18 = sphi %s1582_s18, %s1976_s18  }
   0x6   : > { %s1607_s24 = sadd.s32 1, %s1545_s21   ;;  %s28_s25 = sadd.s32 1, %s1541_s20 }
   0x7   : > { %s25_s26 = ssub.s32 %s1545_s21, %s1607_s24  ;;  %p35_p0 = scmp.ne.s32.totalorder %s1541_s20, %s1537_s19 }
   0x8   : > { %p26_p1 = scmp.eq.s32.totalorder %s25_s26, 0  ;;  %p36_p2 = scmp.eq.s32.totalorder %s1545_s21, 0 }
   0x9   : > { %p41_p3 = scmp.ne.s32.totalorder %s1537_s19, %s1533_s18  ;;  %p42_p4 = scmp.eq.s32.totalorder %s1603_s22, 0 }
   0xa   : > { %s1619_s27 = scalar_select %p26_p1, %s1541_s20, %s28_s25  }
   0xb   : > { %p1621_p5 = por %p36_p2, %p35_p0  ;;  %p1625_p6 = por %p42_p4, %p41_p3 }
   0xc   : > { %p149_p7 = scmp.eq.s32.totalorder %s1603_s22, 3  ;;  %p155_p8 = scmp.eq.s32.totalorder %s1282_s23, 3 }
   0xd   : > { %p1410_p9 = scmp.lt.s32.totalorder %s1545_s21, 4  ;;  %s187_s7 = sand.u32 1, %s1541_s20  }
   0xe   : > { %p1631_p10 = por %p149_p7, %p35_p0  ;;  %p1635_p11 = por %p155_p8, %p41_p3 }
   0xf   : > { %s1332_s8 = sshll.u32 %s1545_s21, 10  ;;  %s1285_s9 = sshll.u32 %s187_s7, 6 }
  0x10   : > { %s1969_s30 = scalar_select %p1631_p10, 1, 0 }
  0x11   : > { %s1970_s6 = scalar_select %p1635_p11, 1, 0 }
  0x12   : > { %s1644_s12 = scalar_lea.hbm %s1960_s0, %s1332_s8  ;;  %s191_s13 = scalar_lea.vmem [#allocation2], %s1285_s9 }
  0x13   : > { %s199_s14 = sshll.u32 %s191_s13, 4  ;;  %p1648_p12 = pnand %p1410_p9, %p1621_p5  ;;  %s1652_s14 = int_to_ptr.vmem [resolvable:$true] %s199_s14 }
  0x14   : > { %s188_s16 = scalar_lea.sflag [#allocation3], %s187_s7  ;;  %s1449_s17 = scalar_lea.hbm %s1644_s12, 1024 }
  0x15   : > { %p1450_p1 = scmp.ne.s32.totalorder %s1644_s12, %s1449_s17  ;;  %p1451_p2 = pneg %p1648_p12 }
  0x16   : > { %s1454_s26 = scalar_lea.hbm %s1960_s0, 4096  ;;  %p1455_p5 = scmp.lt.u32.totalorder %s1644_s12, %s1960_s0 }
  0x17   : > { %p1452_p3 = pnand %p1451_p2, %p1450_p1  ;;  %p1456_p7 = scmp.lt.u32.totalorder %s1454_s26, %s1449_s17 }
  0x18   : > { %p1458_p9 = scmp.lt.u32.totalorder %s1449_s17, %s1644_s12 }
  0x19   : > { %p1453_p4 = pneg %p1452_p3  ;;  %p1457_p8 = por %p1456_p7, %p1455_p5 }
  0x1b   : > { %p1459_p13 = por %p1458_p9, %p1457_p8 }
  0x1d   : > { %p1460_p0 = pnand %p1459_p13, %p1453_p4 }
  0x1f   : > { %1463 = shalt.err (!%p1460_p0)
}
  0x20   : > { %s1464_s7 = scalar_lea.vmem %s1652_s14, 1024  ;;  %s1547_s9 = smov [#allocation2]  }
  0x21   : > { %p1465_p1 = scmp.ne.s32.totalorder %s1652_s14, %s1464_s7  ;;  %s1469_s10 = sshll.u32 %s1547_s9, 4  ;;  %s1470_s10 = int_to_ptr.vmem [resolvable:$false] %s1469_s10 }
  0x22   : > { %s1471_s11 = scalar_lea.vmem %s1470_s10, 2048  ;;  %p1472_p10 = scmp.lt.s32.totalorder %s1652_s14, %s1470_s10 }
  0x23   : > { %p1467_p3 = pnand %p1465_p1, %p1451_p2  ;;  %p1473_p5 = scmp.lt.s32.totalorder %s1471_s11, %s1464_s7 }
  0x25   : > { %p1468_p11 = pneg %p1467_p3  ;;  %p1474_p7 = por %p1473_p5, %p1472_p10 }
  0x27   : > { %p1475_p8 = pnand %p1474_p7, %p1468_p11 }
  0x29   : > { %1478 = shalt.err (!%p1475_p8)
}
  0x2a   : > { %1405 = dma.hbm_to_vmem [thread:$0]  (!%p1648_p12), %s1644_s12, 1024, %s1652_s14, %s188_s16  }
  0x2b   : > { %p1972_p13 = scmp.lt.s32.totalorder %s1545_s21, 5  ;;  %p1973_p0 = scmp.ge.s32.totalorder %s1545_s21, 1 }
  0x2d   : > { %p205_p2 = pnand %p1973_p0, %p1972_p13 }
  0x2e   : > { %s1686_s13 = sand.u32 (!%p205_p2), 1, %s1537_s19  }
  0x2f   : > { %208 = sbr.rel (%p205_p2) target bundleno = 578 (0x242), region = 40  ;;  %s1289_s17 = sshll.u32 (!%p205_p2), %s1686_s13, 6 }
  0x30   : > { %s211_s23 = scalar_lea.sflag (!%p205_p2), [#allocation3], %s1686_s13  ;;  %s214_s25 = scalar_lea.vmem (!%p205_p2), [#allocation2], %s1289_s17 }
  0x36   : > { %1524 = dma.done.wait (%p1625_p6), %s211_s23, 1024  }
  0x37   : > { %1526 = vsyncadd (%p1625_p6), %s211_s23, 4294966272  ;;  %v1548_v0 = vmov 0.0   ;;  %v1549_v1 = vmov 0   ;;  %v252_v2 = vld [vmem:[%s214_s25 + $0x8] sm:$0xff]  ;;  %v254_v3 = vld [vmem:[%s214_s25 + $0x18] sm:$0xff]  ;;  %vm307_vm0 = vcmask 64512  }
  0x38   : > { %396 = vmatprep.mubr.f32.mxu0 %v1548_v0  ;;  %509 = vmatprep.mubr.f32.mxu1 %v1548_v0  ;;  %v251_v4 = vld [vmem:[%s214_s25] sm:$0xff]  ;;  %v253_v5 = vld [vmem:[%s214_s25 + $0x10] sm:$0xff]  ;;  %v256_v7 = vld [vmem:[%s214_s25 + $0x28] sm:$0xff]  ;;  %vm849_vm1 = vcmask 523264   ;;  %s1290_s28 = sshll.u32 %s1686_s13, 4  ;;  %s1333_s7 = sshll.u32 %s1603_s22, 8 }
  0x39   : > { %1447 = vset.pattern.permute.xlu0 %v1549_v1  ;;  %1448 = vset.pattern.permute.xlu1 %v1549_v1  ;;  %v1699_v6 = vld [vmem:[%s1961_s1] sm:$0xff]  ;;  %v258_v8 = vld [vmem:[%s214_s25 + $0x38] sm:$0xff]  ;;  %v257_v10 = vld [vmem:[%s214_s25 + $0x30] sm:$0xff]  ;;  %s240_s8 = scalar_lea.vmem [#allocation5], %s1290_s28  ;;  %s1917_s17 = scalar_lea.hbm %s1965_s5, %s1333_s7 }
  0x3a   : > { %332 = vmatprep.subr.mxu0 %v252_v2  ;;  %445 = vmatprep.subr.mxu1 %v254_v3  ;;  %v255_v9 = vld [vmem:[%s214_s25 + $0x20] sm:$0xff]  ;;  %v244_v11 = vld [vmem:[%s1961_s1 + $0x8] sm:$0xff]  ;;  %v261_v13 = vld [vmem:[%s1962_s2 + $0x10] sm:$0xff]  ;;  %s1212_s9 = sshll.u32 %s240_s8, 4  ;;  %s1198_s23 = scalar_lea.sflag [#allocation4], %s1686_s13  ;;  %s1919_s9 = int_to_ptr.vmem [resolvable:$true] %s1212_s9 }
  0x3b   : > { %333 = vmatpush1.msra.mxu0 %v251_v4  ;;  %446 = vmatpush1.msra.mxu1 %v253_v5  ;;  %v259_v12 = vld [vmem:[%s1962_s2] sm:$0xff]  ;;  %v245_v14 = vld [vmem:[%s1961_s1 + $0x10] sm:$0xff]  ;;  %v260_v15 = vld [vmem:[%s1962_s2 + $0x8] sm:$0xff]  ;;  %s1479_s25 = scalar_lea.vmem %s1919_s9, 256  ;;  %p1974_p10 = scmp.ne.s32.totalorder %s1969_s30, 0 }
  0x3c   : > { %1291 = vmatmul.mubr.msk.f32.vlgmr.msra.gmra.mrb[0].mxu0 %vm307_vm0, %v1699_v6  ;;  %1299 = vmatmul.mubr.msk.f32.vlgmr.msra.gmra.mrb[0].mxu1 %vm307_vm0, %v1699_v6  ;;  %v262_v16 = vld [vmem:[%s1962_s2 + $0x18] sm:$0xff]  ;;  %v263_v18 = vld [vmem:[%s1962_s2 + $0x20] sm:$0xff]  ;;  %v264_v19 = vld [vmem:[%s1962_s2 + $0x28] sm:$0xff]  ;;  %p1480_p6 = scmp.ne.s32.totalorder %s1919_s9, %s1479_s25  ;;  %s1551_s22 = smov [#allocation5]  }
  0x3d   : > { %558 = vmatprep.subr.mxu0 %v256_v7  ;;  %671 = vmatprep.subr.mxu1 %v258_v8  ;;  %v246_v17 = vld [vmem:[%s1961_s1 + $0x18] sm:$0xff]  ;;  %v247_v20 = vld [vmem:[%s1961_s1 + $0x20] sm:$0xff]  ;;  %v265_v21 = vld [vmem:[%s1962_s2 + $0x30] sm:$0xff]  ;;  %s1483_s12 = sshll.u32 %s1551_s22, 4  ;;  %s1484_s12 = int_to_ptr.vmem [resolvable:$false] %s1483_s12 }
  0x3e   : > { %559 = vmatpush1.msra.mxu0 %v255_v9  ;;  %672 = vmatpush1.msra.mxu1 %v257_v10  ;;  %v266_v22 = vld [vmem:[%s1962_s2 + $0x38] sm:$0xff]  ;;  %v248_v23 = vld [vmem:[%s1961_s1 + $0x28] sm:$0xff]  ;;  %v1137_v24 = vld [vmem:[%s1964_s4] sm:$0x3]  ;;  %p1481_p11 = pnand %p1480_p6, %p1974_p10  ;;  %s1485_s14 = scalar_lea.vmem %s1484_s12, 512 }
  0x3f   : > { %402 = vmatprep.mubr.f32.mxu0 %v1548_v0  ;;  %515 = vmatprep.mubr.f32.mxu1 %v1548_v0  ;;  %v249_v25 = vld [vmem:[%s1961_s1 + $0x30] sm:$0xff]  ;;  %v250_v26 = vld [vmem:[%s1961_s1 + $0x38] sm:$0xff]  ;;  %p1486_p4 = scmp.lt.s32.totalorder %s1919_s9, %s1484_s12  ;;  %p1487_p9 = scmp.lt.s32.totalorder %s1485_s14, %s1479_s25 }
  0x40   : > { %1292 = vmatmul.mubr.msk.f32.gmra.mrb[2].mxu0 %vm307_vm0, %v244_v11  ;;  %1300 = vmatmul.mubr.msk.f32.gmra.mrb[2].mxu1 %vm307_vm0, %v244_v11  ;;  %p1482_p12 = pneg %p1481_p11 }
  0x41   : > { %408 = vmatprep.mubr.f32.mxu0 %v1548_v0  ;;  %521 = vmatprep.mubr.f32.mxu1 %v1548_v0  ;;  %p1488_p1 = por %p1487_p9, %p1486_p4 }
  0x42   : > { %269 = vperm.xlu0 %1447, %v259_v12   ;;  %279 = vperm.xlu1 %1448, %v261_v13  }
  0x43   : > { %p1489_p3 = pnand %p1488_p1, %p1482_p12 }
  0x44   : > { %1293 = vmatmul.mubr.msk.f32.gmra.mrb[4].mxu0 %vm307_vm0, %v245_v14  ;;  %1301 = vmatmul.mubr.msk.f32.gmra.mrb[4].mxu1 %vm307_vm0, %v245_v14 }
  0x45   : > { %414 = vmatprep.mubr.f32.mxu0 %v1548_v0  ;;  %527 = vmatprep.mubr.f32.mxu1 %v1548_v0 }
  0x46   : > { %274 = vperm.xlu0 %1447, %v260_v15   ;;  %284 = vperm.xlu1 %1448, %v262_v16  }
  0x48   : > { %1294 = vmatmul.mubr.msk.f32.gmra.mrb[6].mxu0 %vm307_vm0, %v246_v17  ;;  %1302 = vmatmul.mubr.msk.f32.gmra.mrb[6].mxu1 %vm307_vm0, %v246_v17 }
  0x49   : > { %420 = vmatprep.mubr.f32.mxu0 %v1548_v0  ;;  %533 = vmatprep.mubr.f32.mxu1 %v1548_v0 }
  0x4a   : > { %289 = vperm.xlu0 %1447, %v263_v18   ;;  %294 = vperm.xlu1 %1448, %v264_v19  }
  0x4c   : > { %1295 = vmatmul.mubr.msk.f32.gmra.mrb[8].mxu0 %vm307_vm0, %v247_v20  ;;  %1303 = vmatmul.mubr.msk.f32.gmra.mrb[8].mxu1 %vm307_vm0, %v247_v20 }
  0x4d   : > { %426 = vmatprep.mubr.f32.mxu0 %v1548_v0  ;;  %539 = vmatprep.mubr.f32.mxu1 %v1548_v0 }
  0x4e   : > { %299 = vperm.xlu0 %1447, %v265_v21   ;;  %304 = vperm.xlu1 %1448, %v266_v22  }
  0x50   : > { %1296 = vmatmul.mubr.msk.f32.gmra.mrb[10].mxu0 %vm307_vm0, %v248_v23  ;;  %1304 = vmatmul.mubr.msk.f32.gmra.mrb[10].mxu1 %vm307_vm0, %v248_v23 }
  0x51   : > { %432 = vmatprep.mubr.f32.mxu0 %v1548_v0  ;;  %545 = vmatprep.mubr.f32.mxu1 %v1548_v0 }
  0x52   : > { %1140 = vperm.xlu0 %1447, %v1137_v24  }
  0x54   : > { %1297 = vmatmul.mubr.msk.f32.gmra.mrb[12].mxu0 %vm307_vm0, %v249_v25  ;;  %1305 = vmatmul.mubr.msk.f32.gmra.mrb[12].mxu1 %vm307_vm0, %v249_v25 }
  0x55   : > { %438 = vmatprep.mubr.f32.mxu0 %v1548_v0  ;;  %551 = vmatprep.mubr.f32.mxu1 %v1548_v0 }
  0x58   : > { %1298 = vmatmul.mubr.msk.f32.gmra.mrb[14].mxu0 %vm307_vm0, %v250_v26  ;;  %1306 = vmatmul.mubr.msk.f32.gmra.mrb[14].mxu1 %vm307_vm0, %v250_v26 }
  0x59   : > { %622 = vmatprep.mubr.f32.mxu0 %v1548_v0  ;;  %735 = vmatprep.mubr.f32.mxu1 %v1548_v0 }
  0x5c   : > { %1307 = vmatmul.mubr.msk.f32.vlgmr.msra.gmra.mrb[16].mxu0 %vm307_vm0, %v1699_v6  ;;  %1315 = vmatmul.mubr.msk.f32.vlgmr.msra.gmra.mrb[16].mxu1 %vm307_vm0, %v1699_v6 }
  0x5d   : > { %628 = vmatprep.mubr.f32.mxu0 %v1548_v0  ;;  %741 = vmatprep.mubr.f32.mxu1 %v1548_v0 }
  0x60   : > { %1308 = vmatmul.mubr.msk.f32.gmra.mrb[18].mxu0 %vm307_vm0, %v244_v11  ;;  %1316 = vmatmul.mubr.msk.f32.gmra.mrb[18].mxu1 %vm307_vm0, %v244_v11 }
  0x61   : > { %634 = vmatprep.mubr.f32.mxu0 %v1548_v0  ;;  %747 = vmatprep.mubr.f32.mxu1 %v1548_v0 }
  0x64   : > { %1309 = vmatmul.mubr.msk.f32.gmra.mrb[20].mxu0 %vm307_vm0, %v245_v14  ;;  %1317 = vmatmul.mubr.msk.f32.gmra.mrb[20].mxu1 %vm307_vm0, %v245_v14 }
  0x65   : > { %640 = vmatprep.mubr.f32.mxu0 %v1548_v0  ;;  %753 = vmatprep.mubr.f32.mxu1 %v1548_v0 }
  0x68   : > { %1310 = vmatmul.mubr.msk.f32.gmra.mrb[22].mxu0 %vm307_vm0, %v246_v17  ;;  %1318 = vmatmul.mubr.msk.f32.gmra.mrb[22].mxu1 %vm307_vm0, %v246_v17 }
  0x69   : > { %646 = vmatprep.mubr.f32.mxu0 %v1548_v0  ;;  %759 = vmatprep.mubr.f32.mxu1 %v1548_v0 }
  0x6c   : > { %1311 = vmatmul.mubr.msk.f32.gmra.mrb[24].mxu0 %vm307_vm0, %v247_v20  ;;  %1319 = vmatmul.mubr.msk.f32.gmra.mrb[24].mxu1 %vm307_vm0, %v247_v20 }
  0x6d   : > { %652 = vmatprep.mubr.f32.mxu0 %v1548_v0  ;;  %765 = vmatprep.mubr.f32.mxu1 %v1548_v0 }
  0x70   : > { %1312 = vmatmul.mubr.msk.f32.gmra.mrb[26].mxu0 %vm307_vm0, %v248_v23  ;;  %1320 = vmatmul.mubr.msk.f32.gmra.mrb[26].mxu1 %vm307_vm0, %v248_v23 }
  0x71   : > { %658 = vmatprep.mubr.f32.mxu0 %v1548_v0  ;;  %771 = vmatprep.mubr.f32.mxu1 %v1548_v0 }
  0x74   : > { %1313 = vmatmul.mubr.msk.f32.gmra.mrb[28].mxu0 %vm307_vm0, %v249_v25  ;;  %1321 = vmatmul.mubr.msk.f32.gmra.mrb[28].mxu1 %vm307_vm0, %v249_v25 }
  0x75   : > { %664 = vmatprep.mubr.f32.mxu0 %v1548_v0  ;;  %777 = vmatprep.mubr.f32.mxu1 %v1548_v0 }
  0x78   : > { %1314 = vmatmul.mubr.msk.f32.gmra.mrb[30].mxu0 %vm307_vm0, %v250_v26  ;;  %1322 = vmatmul.mubr.msk.f32.gmra.mrb[30].mxu1 %vm307_vm0, %v250_v26 }
  0x79   : > { %917 = vmatprep.mubr.f32.mxu0 %v1548_v0  ;;  %988 = vmatprep.mubr.f32.mxu1 %v1548_v0 }
  0xc1   : > { %v1817_v27 = vpop.permute.xlu0 %269  ;;  %v1823_v35 = vpop.permute.xlu1 %279 }
  0xc5   : > { %v1819_v32 = vpop.permute.xlu0 %274  ;;  %v1831_v62 = vpop.permute.xlu1 %284 }
  0xc9   : > { %v1841_v12 = vpop.permute.xlu0 %289 }
 0x10f   : > { %v398_v28 = vpop.f32.mrb[0].mxu0  ;;  %v511_v29 = vpop.f32.mrb[0].mxu1 }
 0x110   : > { %v400_v30 = vpop.f32.mrb[1].mxu0  ;;  %v513_v31 = vpop.f32.mrb[1].mxu1  ;;  %v399_v33 = vadd.f32 %v398_v28, %v1817_v27  ;;  %v512_v34 = vadd.f32 %v511_v29, %v1817_v27 }
 0x111   : > { %v401_v36 = vadd.f32 %v400_v30, %v1817_v27  ;;  %v514_v37 = vadd.f32 %v513_v31, %v1817_v27  ;;  %v1843_v30 = vpop.permute.xlu1 %294 }
 0x112   : > { %v784_v46 = vmax.f32 %v399_v33, 0.0  ;;  %v786_v47 = vmax.f32 %v512_v34, 0.0 }
 0x113   : > { %v404_v38 = vpop.f32.mrb[2].mxu0  ;;  %v517_v39 = vpop.f32.mrb[2].mxu1  ;;  %v785_v50 = vmax.f32 %v401_v36, 0.0  ;;  %v787_v51 = vmax.f32 %v514_v37, 0.0 }
 0x114   : > { %v405_v40 = vadd.f32 %v404_v38, %v1819_v32  ;;  %v518_v41 = vadd.f32 %v517_v39, %v1819_v32  ;;  %v406_v42 = vpop.f32.mrb[3].mxu0  ;;  %v519_v43 = vpop.f32.mrb[3].mxu1 }
 0x115   : > { %v407_v44 = vadd.f32 %v406_v42, %v1819_v32  ;;  %v520_v45 = vadd.f32 %v519_v43, %v1819_v32 }
 0x116   : > { %v792_v48 = vmax.f32 %v405_v40, 0.0  ;;  %v794_v49 = vmax.f32 %v518_v41, 0.0 }
 0x117   : > { %v793_v52 = vmax.f32 %v407_v44, 0.0  ;;  %v795_v53 = vmax.f32 %v520_v45, 0.0  ;;  %v410_v54 = vpop.f32.mrb[4].mxu0  ;;  %v523_v55 = vpop.f32.mrb[4].mxu1 }
 0x118   : > { %v1336_v56 = vpack.c.bf16 %v792_v48, %v784_v46  ;;  %v1352_v57 = vpack.c.bf16 %v794_v49, %v786_v47  ;;  %v412_v58 = vpop.f32.mrb[5].mxu0  ;;  %v525_v59 = vpop.f32.mrb[5].mxu1  ;;  %v411_v63 = vadd.f32 %v410_v54, %v1823_v35  ;;  %v524_v1 = vadd.f32 %v523_v55, %v1823_v35 }
 0x119   : > { %v1334_v60 = vpack.c.bf16 %v793_v52, %v785_v50  ;;  %v1350_v61 = vpack.c.bf16 %v795_v53, %v787_v51  ;;  %v413_v2 = vadd.f32 %v412_v58, %v1823_v35  ;;  %v526_v3 = vadd.f32 %v525_v59, %v1823_v35  ;;  %v1853_v45 = vpop.permute.xlu0 %299 }
 0x11a   : > { %v800_v13 = vmax.f32 %v411_v63, 0.0  ;;  %v802_v14 = vmax.f32 %v524_v1, 0.0  ;;  %v1855_v63 = vpop.permute.xlu1 %304 }
 0x11b   : > { %v416_v4 = vpop.f32.mrb[6].mxu0  ;;  %v529_v5 = vpop.f32.mrb[6].mxu1  ;;  %1335 = vmatprep.subr.bf16.mxu0 %v1334_v60  ;;  %1351 = vmatprep.subr.bf16.mxu1 %v1350_v61  ;;  %v801_v17 = vmax.f32 %v413_v2, 0.0  ;;  %v803_v18 = vmax.f32 %v526_v3, 0.0 }
 0x11c   : > { %v417_v6 = vadd.f32 %v416_v4, %v1831_v62  ;;  %v530_v7 = vadd.f32 %v529_v5, %v1831_v62  ;;  %v418_v8 = vpop.f32.mrb[7].mxu0  ;;  %v531_v9 = vpop.f32.mrb[7].mxu1  ;;  %1337 = vmatpush1.bf16.msra.mxu0 %v1336_v56  ;;  %1353 = vmatpush1.bf16.msra.mxu1 %v1352_v57 }
 0x11d   : > { %v419_v10 = vadd.f32 %v418_v8, %v1831_v62  ;;  %v532_v11 = vadd.f32 %v531_v9, %v1831_v62 }
 0x11e   : > { %v808_v15 = vmax.f32 %v417_v6, 0.0  ;;  %v810_v16 = vmax.f32 %v530_v7, 0.0 }
 0x11f   : > { %v809_v19 = vmax.f32 %v419_v10, 0.0  ;;  %v811_v20 = vmax.f32 %v532_v11, 0.0  ;;  %v422_v21 = vpop.f32.mrb[8].mxu0  ;;  %v535_v22 = vpop.f32.mrb[8].mxu1 }
 0x120   : > { %v1340_v23 = vpack.c.bf16 %v808_v15, %v800_v13  ;;  %v1356_v24 = vpack.c.bf16 %v810_v16, %v802_v14  ;;  %v424_v25 = vpop.f32.mrb[9].mxu0  ;;  %v537_v26 = vpop.f32.mrb[9].mxu1  ;;  %v423_v31 = vadd.f32 %v422_v21, %v1841_v12  ;;  %v536_v33 = vadd.f32 %v535_v22, %v1841_v12 }
 0x121   : > { %v1338_v28 = vpack.c.bf16 %v809_v19, %v801_v17  ;;  %v1354_v29 = vpack.c.bf16 %v811_v20, %v803_v18  ;;  %v425_v34 = vadd.f32 %v424_v25, %v1841_v12  ;;  %v538_v36 = vadd.f32 %v537_v26, %v1841_v12 }
 0x122   : > { %v816_v46 = vmax.f32 %v423_v31, 0.0  ;;  %v818_v47 = vmax.f32 %v536_v33, 0.0 }
 0x123   : > { %v428_v37 = vpop.f32.mrb[10].mxu0  ;;  %v541_v38 = vpop.f32.mrb[10].mxu1  ;;  %1339 = vmatprep.subr.bf16.mxu0 %v1338_v28  ;;  %1355 = vmatprep.subr.bf16.mxu1 %v1354_v29  ;;  %v817_v50 = vmax.f32 %v425_v34, 0.0  ;;  %v819_v51 = vmax.f32 %v538_v36, 0.0 }
 0x124   : > { %v429_v39 = vadd.f32 %v428_v37, %v1843_v30  ;;  %v542_v40 = vadd.f32 %v541_v38, %v1843_v30  ;;  %v430_v41 = vpop.f32.mrb[11].mxu0  ;;  %v543_v42 = vpop.f32.mrb[11].mxu1  ;;  %1341 = vmatpush1.bf16.msra.mxu0 %v1340_v23  ;;  %1357 = vmatpush1.bf16.msra.mxu1 %v1356_v24 }
 0x125   : > { %v431_v43 = vadd.f32 %v430_v41, %v1843_v30  ;;  %v544_v44 = vadd.f32 %v543_v42, %v1843_v30 }
 0x126   : > { %v824_v48 = vmax.f32 %v429_v39, 0.0  ;;  %v826_v49 = vmax.f32 %v542_v40, 0.0 }
 0x127   : > { %v825_v52 = vmax.f32 %v431_v43, 0.0  ;;  %v827_v53 = vmax.f32 %v544_v44, 0.0  ;;  %v434_v54 = vpop.f32.mrb[12].mxu0  ;;  %v547_v55 = vpop.f32.mrb[12].mxu1  ;;  %v1874_v44 = vld [vmem:[%s1963_s3] sm:$0xff] }
 0x128   : > { %v1344_v56 = vpack.c.bf16 %v824_v48, %v816_v46  ;;  %v1360_v57 = vpack.c.bf16 %v826_v49, %v818_v47  ;;  %v436_v58 = vpop.f32.mrb[13].mxu0  ;;  %v549_v59 = vpop.f32.mrb[13].mxu1  ;;  %v435_v1 = vadd.f32 %v434_v54, %v1853_v45  ;;  %v548_v2 = vadd.f32 %v547_v55, %v1853_v45 }
 0x129   : > { %v1342_v60 = vpack.c.bf16 %v825_v52, %v817_v50  ;;  %v1358_v61 = vpack.c.bf16 %v827_v53, %v819_v51  ;;  %v437_v3 = vadd.f32 %v436_v58, %v1853_v45  ;;  %v550_v4 = vadd.f32 %v549_v59, %v1853_v45 }
 0x12a   : > { %v832_v14 = vmax.f32 %v435_v1, 0.0  ;;  %v834_v15 = vmax.f32 %v548_v2, 0.0 }
 0x12b   : > { %v440_v5 = vpop.f32.mrb[14].mxu0  ;;  %v553_v6 = vpop.f32.mrb[14].mxu1  ;;  %1343 = vmatprep.subr.bf16.mxu0 %v1342_v60  ;;  %1359 = vmatprep.subr.bf16.mxu1 %v1358_v61  ;;  %v833_v18 = vmax.f32 %v437_v3, 0.0  ;;  %v835_v19 = vmax.f32 %v550_v4, 0.0 }
 0x12c   : > { %v441_v7 = vadd.f32 %v440_v5, %v1855_v63  ;;  %v554_v8 = vadd.f32 %v553_v6, %v1855_v63  ;;  %v442_v9 = vpop.f32.mrb[15].mxu0  ;;  %v555_v10 = vpop.f32.mrb[15].mxu1  ;;  %1345 = vmatpush1.bf16.msra.mxu0 %v1344_v56  ;;  %1361 = vmatpush1.bf16.msra.mxu1 %v1360_v57 }
 0x12d   : > { %v443_v11 = vadd.f32 %v442_v9, %v1855_v63  ;;  %v556_v13 = vadd.f32 %v555_v10, %v1855_v63 }
 0x12e   : > { %v840_v16 = vmax.f32 %v441_v7, 0.0  ;;  %v842_v17 = vmax.f32 %v554_v8, 0.0 }
 0x12f   : > { %v841_v20 = vmax.f32 %v443_v11, 0.0  ;;  %v843_v21 = vmax.f32 %v556_v13, 0.0  ;;  %v624_v22 = vpop.f32.mrb[16].mxu0  ;;  %v737_v23 = vpop.f32.mrb[16].mxu1 }
 0x130   : > { %v1348_v24 = vpack.c.bf16 %v840_v16, %v832_v14  ;;  %v1364_v25 = vpack.c.bf16 %v842_v17, %v834_v15  ;;  %v626_v26 = vpop.f32.mrb[17].mxu0  ;;  %v739_v28 = vpop.f32.mrb[17].mxu1  ;;  %v625_v33 = vadd.f32 %v624_v22, %v1817_v27  ;;  %v738_v34 = vadd.f32 %v737_v23, %v1817_v27 }
 0x131   : > { %v1346_v29 = vpack.c.bf16 %v841_v20, %v833_v18  ;;  %v1362_v31 = vpack.c.bf16 %v843_v21, %v835_v19  ;;  %v627_v36 = vadd.f32 %v626_v26, %v1817_v27  ;;  %v740_v37 = vadd.f32 %v739_v28, %v1817_v27 }
 0x132   : > { %v788_v47 = vmax.f32 %v625_v33, 0.0  ;;  %v790_v48 = vmax.f32 %v738_v34, 0.0 }
 0x133   : > { %v630_v38 = vpop.f32.mrb[18].mxu0  ;;  %v743_v39 = vpop.f32.mrb[18].mxu1  ;;  %1347 = vmatprep.subr.bf16.mxu0 %v1346_v29  ;;  %1363 = vmatprep.subr.bf16.mxu1 %v1362_v31  ;;  %v789_v51 = vmax.f32 %v627_v36, 0.0  ;;  %v791_v52 = vmax.f32 %v740_v37, 0.0 }
 0x134   : > { %v631_v40 = vadd.f32 %v630_v38, %v1819_v32  ;;  %v744_v41 = vadd.f32 %v743_v39, %v1819_v32  ;;  %v632_v42 = vpop.f32.mrb[19].mxu0  ;;  %v745_v43 = vpop.f32.mrb[19].mxu1  ;;  %1349 = vmatpush1.bf16.msra.mxu0 %v1348_v24  ;;  %1365 = vmatpush1.bf16.msra.mxu1 %v1364_v25 }
 0x135   : > { %v633_v27 = vadd.f32 %v632_v42, %v1819_v32  ;;  %v746_v46 = vadd.f32 %v745_v43, %v1819_v32 }
 0x136   : > { %v796_v49 = vmax.f32 %v631_v40, 0.0  ;;  %v798_v50 = vmax.f32 %v744_v41, 0.0 }
 0x137   : > { %v797_v53 = vmax.f32 %v633_v27, 0.0  ;;  %v799_v54 = vmax.f32 %v746_v46, 0.0  ;;  %v636_v55 = vpop.f32.mrb[20].mxu0  ;;  %v749_v56 = vpop.f32.mrb[20].mxu1  ;;  %1323 = vmatmul.mubr.msk.f32.vlgmr.msra.gmra.mrb[32].mxu0 %vm849_vm1, %v1874_v44  ;;  %1324 = vmatmul.mubr.msk.f32.vlgmr.msra.gmra.mrb[32].mxu1 %vm849_vm1, %v1874_v44 }
 0x138   : > { %v1368_v57 = vpack.c.bf16 %v796_v49, %v788_v47  ;;  %v1384_v58 = vpack.c.bf16 %v798_v50, %v790_v48  ;;  %v638_v59 = vpop.f32.mrb[21].mxu0  ;;  %v751_v32 = vpop.f32.mrb[21].mxu1  ;;  %1059 = vmatprep.mubr.f32.mxu0 %v1548_v0  ;;  %1130 = vmatprep.mubr.f32.mxu1 %v1548_v0  ;;  %v637_v1 = vadd.f32 %v636_v55, %v1823_v35 }
 0x139   : > { %v1366_v60 = vpack.c.bf16 %v797_v53, %v789_v51  ;;  %v1382_v61 = vpack.c.bf16 %v799_v54, %v791_v52  ;;  %v750_v2 = vadd.f32 %v749_v56, %v1823_v35  ;;  %v639_v3 = vadd.f32 %v638_v59, %v1823_v35 }
 0x13a   : > { %v752_v4 = vadd.f32 %v751_v32, %v1823_v35  ;;  %v804_v13 = vmax.f32 %v637_v1, 0.0 }
 0x13b   : > { %v642_v5 = vpop.f32.mrb[22].mxu0  ;;  %v755_v6 = vpop.f32.mrb[22].mxu1  ;;  %1367 = vmatprep.subr.bf16.mxu0 %v1366_v60  ;;  %1383 = vmatprep.subr.bf16.mxu1 %v1382_v61  ;;  %v806_v14 = vmax.f32 %v750_v2, 0.0  ;;  %v805_v16 = vmax.f32 %v639_v3, 0.0 }
 0x13c   : > { %v643_v7 = vadd.f32 %v642_v5, %v1831_v62  ;;  %v756_v8 = vadd.f32 %v755_v6, %v1831_v62  ;;  %v644_v9 = vpop.f32.mrb[23].mxu0  ;;  %v757_v10 = vpop.f32.mrb[23].mxu1  ;;  %1369 = vmatpush1.bf16.msra.mxu0 %v1368_v57  ;;  %1385 = vmatpush1.bf16.msra.mxu1 %v1384_v58  ;;  %v807_v17 = vmax.f32 %v752_v4, 0.0 }
 0x13d   : > { %v645_v0 = vadd.f32 %v644_v9, %v1831_v62  ;;  %v758_v11 = vadd.f32 %v757_v10, %v1831_v62 }
 0x13e   : > { %v812_v15 = vmax.f32 %v643_v7, 0.0  ;;  %v814_v35 = vmax.f32 %v756_v8, 0.0 }
 0x13f   : > { %v813_v18 = vmax.f32 %v645_v0, 0.0  ;;  %v815_v19 = vmax.f32 %v758_v11, 0.0  ;;  %v648_v20 = vpop.f32.mrb[24].mxu0  ;;  %v761_v21 = vpop.f32.mrb[24].mxu1 }
 0x140   : > { %v1372_v22 = vpack.c.bf16 %v812_v15, %v804_v13  ;;  %v1388_v23 = vpack.c.bf16 %v814_v35, %v806_v14  ;;  %v650_v24 = vpop.f32.mrb[25].mxu0  ;;  %v763_v25 = vpop.f32.mrb[25].mxu1  ;;  %v649_v29 = vadd.f32 %v648_v20, %v1841_v12  ;;  %v762_v62 = vadd.f32 %v761_v21, %v1841_v12 }
 0x141   : > { %v1370_v26 = vpack.c.bf16 %v813_v18, %v805_v16  ;;  %v1386_v28 = vpack.c.bf16 %v815_v19, %v807_v17  ;;  %v651_v31 = vadd.f32 %v650_v24, %v1841_v12  ;;  %v764_v33 = vadd.f32 %v763_v25, %v1841_v12 }
 0x142   : > { %v820_v43 = vmax.f32 %v649_v29, 0.0  ;;  %v822_v27 = vmax.f32 %v762_v62, 0.0  ;;  %v1164_v19 = vlaneseq }
 0x143   : > { %v654_v34 = vpop.f32.mrb[26].mxu0  ;;  %v767_v36 = vpop.f32.mrb[26].mxu1  ;;  %1371 = vmatprep.subr.bf16.mxu0 %v1370_v26  ;;  %1387 = vmatprep.subr.bf16.mxu1 %v1386_v28  ;;  %v821_v47 = vmax.f32 %v651_v31, 0.0  ;;  %v823_v48 = vmax.f32 %v764_v33, 0.0 }
 0x144   : > { %v655_v37 = vadd.f32 %v654_v34, %v1843_v30  ;;  %v768_v38 = vadd.f32 %v767_v36, %v1843_v30  ;;  %v656_v39 = vpop.f32.mrb[27].mxu0  ;;  %v769_v40 = vpop.f32.mrb[27].mxu1  ;;  %1373 = vmatpush1.bf16.msra.mxu0 %v1372_v22  ;;  %1389 = vmatpush1.bf16.msra.mxu1 %v1388_v23  ;;  %v1165_v21 = vshrl.u32 %v1164_v19, 7 }
 0x145   : > { %v657_v41 = vadd.f32 %v656_v39, %v1843_v30  ;;  %v770_v42 = vadd.f32 %v769_v40, %v1843_v30  ;;  %v1141_v22 = vpop.permute.xlu0 %1140 }
 0x146   : > { %v828_v46 = vmax.f32 %v655_v37, 0.0  ;;  %v830_v12 = vmax.f32 %v768_v38, 0.0 }
 0x147   : > { %v829_v49 = vmax.f32 %v657_v41, 0.0  ;;  %v831_v50 = vmax.f32 %v770_v42, 0.0  ;;  %v660_v51 = vpop.f32.mrb[28].mxu0  ;;  %v773_v52 = vpop.f32.mrb[28].mxu1 }
 0x148   : > { %v1376_v53 = vpack.c.bf16 %v828_v46, %v820_v43  ;;  %v1392_v54 = vpack.c.bf16 %v830_v12, %v822_v27  ;;  %v662_v55 = vpop.f32.mrb[29].mxu0  ;;  %v775_v56 = vpop.f32.mrb[29].mxu1  ;;  %v661_v59 = vadd.f32 %v660_v51, %v1853_v45  ;;  %v774_v30 = vadd.f32 %v773_v52, %v1853_v45 }
 0x149   : > { %v1374_v57 = vpack.c.bf16 %v829_v49, %v821_v47  ;;  %v1390_v58 = vpack.c.bf16 %v831_v50, %v823_v48  ;;  %v663_v32 = vadd.f32 %v662_v55, %v1853_v45  ;;  %v776_v60 = vadd.f32 %v775_v56, %v1853_v45 }
 0x14a   : > { %v836_v8 = vmax.f32 %v661_v59, 0.0  ;;  %v838_v9 = vmax.f32 %v774_v30, 0.0 }
 0x14b   : > { %v666_v61 = vpop.f32.mrb[30].mxu0  ;;  %v779_v1 = vpop.f32.mrb[30].mxu1  ;;  %1375 = vmatprep.subr.bf16.mxu0 %v1374_v57  ;;  %1391 = vmatprep.subr.bf16.mxu1 %v1390_v58  ;;  %v837_v0 = vmax.f32 %v663_v32, 0.0  ;;  %v839_v11 = vmax.f32 %v776_v60, 0.0 }
 0x14c   : > { %v667_v2 = vadd.f32 %v666_v61, %v1855_v63  ;;  %v780_v3 = vadd.f32 %v779_v1, %v1855_v63  ;;  %v668_v4 = vpop.f32.mrb[31].mxu0  ;;  %v781_v5 = vpop.f32.mrb[31].mxu1  ;;  %1377 = vmatpush1.bf16.msra.mxu0 %v1376_v53  ;;  %1393 = vmatpush1.bf16.msra.mxu1 %v1392_v54 }
 0x14d   : > { %v669_v6 = vadd.f32 %v668_v4, %v1855_v63  ;;  %v782_v7 = vadd.f32 %v781_v5, %v1855_v63  ;;  %v1550_v63 = vmov 1983009808  }
 0x14e   : > { %v844_v10 = vmax.f32 %v667_v2, 0.0  ;;  %v846_v45 = vmax.f32 %v780_v3, 0.0  ;;  %v1162_v18 = vunpack.c.l.s4 %v1550_v63 }
 0x14f   : > { %v845_v13 = vmax.f32 %v669_v6, 0.0  ;;  %v847_v14 = vmax.f32 %v782_v7, 0.0 }
 0x150   : > { %v1380_v15 = vpack.c.bf16 %v844_v10, %v836_v8  ;;  %v1396_v35 = vpack.c.bf16 %v846_v45, %v838_v9  ;;  %v1163_v20 = vunpack.c.0.s8 %v1162_v18 }
 0x151   : > { %v1378_v16 = vpack.c.bf16 %v845_v13, %v837_v0  ;;  %v1394_v17 = vpack.c.bf16 %v847_v14, %v839_v11 }
 0x152   : > { %v1166_v31 = vsub.s32 %v1163_v20, %v1165_v21 }
 0x153   : > { %1379 = vmatprep.subr.bf16.mxu0 %v1378_v16  ;;  %1395 = vmatprep.subr.bf16.mxu1 %v1394_v17 }
 0x154   : > { %1381 = vmatpush1.bf16.msra.mxu0 %v1380_v15  ;;  %1397 = vmatpush1.bf16.msra.mxu1 %v1396_v35 }
 0x157   : > { %1325 = vmatmul.mubr.msk.f32.vlgmr.msra.gmra.mrb[34].mxu0 %vm849_vm1, %v1874_v44  ;;  %1326 = vmatmul.mubr.msk.f32.vlgmr.msra.gmra.mrb[34].mxu1 %vm849_vm1, %v1874_v44 }
 0x20a   : > { %v919_v23 = vpop.f32.mrb[32].mxu0  ;;  %v990_v24 = vpop.f32.mrb[32].mxu1 }
 0x20b   : > { %v1143_v25 = vadd.f32 %v1141_v22, %v919_v23  ;;  %v1145_v26 = vadd.f32 %v1141_v22, %v990_v24  ;;  %v921_v28 = vpop.f32.mrb[33].mxu0  ;;  %v992_v29 = vpop.f32.mrb[33].mxu1 }
 0x20c   : > { %v1144_v62 = vadd.f32 %v1141_v22, %v921_v28  ;;  %v1146_v33 = vadd.f32 %v1141_v22, %v992_v29 }
 0x20e   : > { %v1159_v34 = vcombine.low %v1143_v25, %v1144_v62  ;;  %v1160_v36 = vcombine.low %v1145_v26, %v1146_v33 }
 0x210   : > { %v1167_v44 = vrot.slane %v1159_v34, %v1166_v31  ;;  %v1174_v37 = vrot.slane %v1160_v36, %v1166_v31 }
 0x212   : > { %v1175_v38 = vcombine.low %v1167_v44, %v1174_v37 }
 0x214   : > { %1195 = vst [vmem:[%s240_s8] sm:$0xff] %v1175_v38 }
 0x22a   : > { %v1061_v39 = vpop.f32.mrb[34].mxu0  ;;  %v1132_v40 = vpop.f32.mrb[34].mxu1 }
 0x22b   : > { %v1147_v41 = vadd.f32 %v1141_v22, %v1061_v39  ;;  %v1149_v42 = vadd.f32 %v1141_v22, %v1132_v40  ;;  %v1063_v43 = vpop.f32.mrb[35].mxu0  ;;  %v1134_v27 = vpop.f32.mrb[35].mxu1 }
 0x22c   : > { %v1148_v46 = vadd.f32 %v1141_v22, %v1063_v43  ;;  %v1150_v12 = vadd.f32 %v1141_v22, %v1134_v27 }
 0x22e   : > { %v1176_v47 = vcombine.low %v1147_v41, %v1148_v46  ;;  %v1177_v48 = vcombine.low %v1149_v42, %v1150_v12 }
 0x230   : > { %v1184_v49 = vrot.slane %v1176_v47, %v1166_v31  ;;  %v1191_v50 = vrot.slane %v1177_v48, %v1166_v31 }
 0x232   : > { %v1192_v51 = vcombine.low %v1184_v49, %v1191_v50 }
 0x234   : > { %1196 = vst [vmem:[%s240_s8 + $0x8] sm:$0xff] %v1192_v51 }
 0x235   : > { %1492 = shalt.err (!%p1489_p3)
}
 0x236   : > { %s1493_s13 = scalar_lea.hbm %s1917_s17, 256  ;;  %s1497_s16 = scalar_lea.hbm %s1965_s5, 1024 }
 0x237   : > { %p1494_p5 = scmp.ne.s32.totalorder %s1917_s17, %s1493_s13  ;;  %p1498_p13 = scmp.lt.u32.totalorder %s1917_s17, %s1965_s5 }
 0x238   : > { %p1499_p0 = scmp.lt.u32.totalorder %s1497_s16, %s1493_s13  ;;  %p1501_p6 = scmp.lt.u32.totalorder %s1493_s13, %s1917_s17 }
 0x239   : > { %p1495_p7 = pnand %p1494_p5, %p1974_p10 }
 0x23a   : > { %p1500_p2 = por %p1499_p0, %p1498_p13 }
 0x23b   : > { %p1496_p8 = pneg %p1495_p7 }
 0x23c   : > { %p1502_p11 = por %p1501_p6, %p1500_p2 }
 0x23e   : > { %p1503_p12 = pnand %p1502_p11, %p1496_p8 }
 0x240   : > { %1506 = shalt.err (!%p1503_p12)
}
 0x241   : > { %1400 = dma.vmem_to_hbm [thread:$0]  (%p1974_p10), %s1919_s9, 256, %s1917_s17, %s1198_s23  }
 0x242 PF: > { %p1411_p4 = scmp.ge.s32.totalorder %s1545_s21, 2  ;;  %s1224_s8 = sand.u32 1, %s1533_s18  }
 0x243   : > { %p1975_p9 = scmp.ne.s32.totalorder %s1970_s6, 0  ;;  %s1225_s7 = scalar_lea.sflag [#allocation4], %s1224_s8 }
 0x245   : > { %p1407_p1 = pnand %p1411_p4, %p1975_p9 }
 0x247   : > { %1528 = dma.done.wait (!%p1407_p1), %s1225_s7, 256  }
 0x248   : > { %1530 = vsyncadd (!%p1407_p1), %s1225_s7, 4294967040  ;;  %p18_p3 = scmp.ge.s32.totalorder %s1607_s24, 6   ;;  %s1976_s18 = smov %s1537_s19 }
 0x249   : > { %s1977_s19 = smov %s1541_s20  ;;  %s1978_s20 = smov %s1619_s27 }
 0x24a   : > { %s1979_s21 = smov %s1607_s24  ;;  %20 = sbr.rel (!%p18_p3) target bundleno = 5 (0x5), region = 85 }
 0x251   :  { %1230 = vsyncpa [#allocation3], 1 }
 0x252   :  { %1232 = vsyncpa [#allocation3 + $0x1], 1 }
 0x253   :  { %1233 = vsyncpa [#allocation4], 1 }
 0x254   :  { %1235 = vsyncpa [#allocation4 + $0x1], 1 }

</bundles_post_ra>
